<compile_context>
chip_gen: v7x
topology: tpu7x:2x2x1
jax: 0.10.0
libtpu: 0.0.40
codegen_flags: <defaults>
</compile_context>

<pallas_src>
import jax
import jax.numpy as jnp
from jax.experimental import pallas as pl
from jax.experimental.pallas import tpu as pltpu


def _round_up(x, m):
    return (x + m - 1) // m * m


def _cdiv(a, b):
    return (a + b - 1) // b


def _block_budget_and_vmem_cap():
    """Per-generation streamed-x tile budget (bytes) and physical VMEM (bytes)."""
    vmem_cap = 64 * 1024 * 1024            # conservative default (v7x per-TC)
    try:
        info = pltpu.get_tpu_info()
        cap = getattr(info, "vmem_capacity_bytes", None)
        if cap:
            vmem_cap = int(cap)
    except Exception:
        pass
    # v5e / v6e: 128 MiB VMEM -> bigger streamed tiles; v7x: 64 MiB -> 8 MiB.
    budget = 12 * 1024 * 1024 if vmem_cap >= 96 * 1024 * 1024 else 8 * 1024 * 1024
    return budget, vmem_cap


def _make_pool_linear_kernel(hw_tile, hw_total):
    """x_ref: (TB, C, hw_tile)   w_ref: (C, Kp) bf16 (pre-scaled by 1/HW)
       b_ref: (1, Kp) f32        o_ref: (TB, Kp) f32
       acc_ref: (TB, C) f32 scratch (sum-pool accumulator)."""
    tail = hw_total % hw_tile               # static: valid lanes in last HW tile

    def kernel(x_ref, w_ref, b_ref, o_ref, acc_ref):
        k = pl.program_id(1)
        nk = pl.num_programs(1)

        @pl.when(k == 0)
        def _():
            acc_ref[...] = jnp.zeros_like(acc_ref)

        if tail == 0:
            # f32-accumulating sum over the lane-tiled spatial axis.
            acc_ref[...] += jnp.sum(x_ref[...], axis=-1, dtype=jnp.float32)
        else:
            @pl.when(k < nk - 1)
            def _():
                acc_ref[...] += jnp.sum(x_ref[...], axis=-1, dtype=jnp.float32)

            @pl.when(k == nk - 1)
            def _():
                # Mask the spatial tail of the edge block (undefined lanes).
                lane = jax.lax.broadcasted_iota(jnp.int32, x_ref.shape, 2)
                xv = jnp.where(lane < tail, x_ref[...], 0.0)
                acc_ref[...] += jnp.sum(xv, axis=-1, dtype=jnp.float32)

        @pl.when(k == nk - 1)
        def _():
            # bf16 x bf16 MXU dot with f32 accumulate (v5e has no native f32 MXU).
            logits = jnp.dot(acc_ref[...].astype(jnp.bfloat16), w_ref[...],
                             preferred_element_type=jnp.float32)   # (TB, Kp)
            o_ref[...] = (logits + b_ref[...]).astype(o_ref.dtype)

    return kernel


def pool_linear(x_nchw, weight, bias):
    """Global-avg-pool over H,W then linear head.
       x_nchw: [B, C, H, W];  weight: [C, K];  bias: [K]  ->  [B, K] f32."""
    B, C, H, W = x_nchw.shape
    K = weight.shape[1]
    HW = H * W
    K_pad = _round_up(K, 128)               # lane-dense output / MXU N dim
    esize = jnp.dtype(x_nchw.dtype).itemsize

    budget, vmem_cap = _block_budget_and_vmem_cap()

    # ---- batch tile: >=2 programs on the parallel axis for v7x megacore,
    #      shrunk (multiples of 8) so the 128-lane floor can't blow the budget.
    if B <= 8:
        tb = B
    else:
        tb = min(_round_up(_cdiv(B, 2), 8), 256)
        while tb > 8 and tb * C * 128 * esize > budget:
            tb = max(8, _round_up(tb // 2, 8))

    # ---- spatial tile: biggest lane-aligned tile within the budget.
    hw_tile = (budget // max(tb * C * esize, 1)) // 128 * 128
    hw_tile = max(128, hw_tile)
    hw_tile = min(hw_tile, _round_up(HW, 128))

    grid = (_cdiv(B, tb), _cdiv(HW, hw_tile))

    # ---- host-side prep: x streamed untouched; only the tiny weights are padded.
    x = x_nchw.reshape(B, C, HW)                                   # free reshape
    w = jnp.pad((weight * (1.0 / HW)).astype(jnp.bfloat16),        # fold 1/HW
                ((0, 0), (0, K_pad - K)))
    b2d = jnp.pad(bias.astype(jnp.float32), (0, K_pad - K)).reshape(1, K_pad)

    # ---- honest VMEM budget (inputs/outputs double-buffered by default) ------
    x_block = tb * C * hw_tile * esize
    w_block = _round_up(C, 16) * K_pad * 2
    b_block = 8 * K_pad * 4
    o_block = _round_up(tb, 8) * K_pad * 4
    acc_bytes = _round_up(tb, 8) * _round_up(C, 128) * 4
    vmem_est = 2 * (x_block + w_block + b_block + o_block) + acc_bytes
    vmem_limit = int(min(max(32 * 1024 * 1024, int(1.5 * vmem_est)),
                         max(32 * 1024 * 1024, int(vmem_cap * 0.9))))

    cost = pl.CostEstimate(
        flops=B * C * HW + 2 * B * C * K_pad,
        transcendentals=0,
        bytes_accessed=x.size * esize + w.size * 2 + b2d.size * 4 + B * K_pad * 4,
    )

    kernel = _make_pool_linear_kernel(hw_tile, HW)

    out = pl.pallas_call(
        kernel,
        out_shape=jax.ShapeDtypeStruct((B, K_pad), jnp.float32),
        grid_spec=pltpu.PrefetchScalarGridSpec(
            num_scalar_prefetch=0,
            grid=grid,
            in_specs=[
                pl.BlockSpec((tb, C, hw_tile), lambda i, k: (i, 0, k)),
                pl.BlockSpec((C, K_pad), lambda i, k: (0, 0)),
                pl.BlockSpec((1, K_pad), lambda i, k: (0, 0)),
            ],
            out_specs=pl.BlockSpec((tb, K_pad), lambda i, k: (i, 0)),
            scratch_shapes=[pltpu.VMEM((tb, C), jnp.float32)],
        ),
        compiler_params=pltpu.CompilerParams(
            dimension_semantics=("parallel", "arbitrary"),
            vmem_limit_bytes=vmem_limit,
        ),
        cost_estimate=cost,
    )(x, w, b2d)

    return out[:, :K]


class TinyVideoClassifier:
    """Concrete inner model: global-avg-pool + linear head (Pallas hot path)."""

    def __init__(self, in_channels, num_classes, key):
        kw, kb = jax.random.split(key)
        self.weight = (jax.random.normal(kw, (in_channels, num_classes),
                                         dtype=jnp.float32) * 0.02)
        self.bias = jax.random.normal(kb, (num_classes,), dtype=jnp.float32) * 0.01
        self._fwd = jax.jit(pool_linear)

    def forward(self, x):
        return self._fwd(x, self.weight, self.bias)

    def features(self, x):
        # alternate entry point, reachable through Wrap(..., func='features')
        B, C, H, W = x.shape
        return x.reshape(B, C, H * W).mean(axis=-1)


class Wrap:
    """JAX equivalent of the PyTorch Wrap module: pure getattr dispatch."""

    def __init__(self, model):
        self.model = model

    def forward(self, *args, func="forward", **kwargs):
        return getattr(self.model, func)(*args, **kwargs)

    __call__ = forward


if __name__ == "__main__":
    key = jax.random.PRNGKey(0)
    k_x, k_m = jax.random.split(key)

    B, C, H, W = 2, 4, 16, 16
    NUM_CLASSES = 8
    x = jax.random.normal(k_x, (B, C, H, W), dtype=jnp.float32)   # NCHW

    model = TinyVideoClassifier(C, NUM_CLASSES, k_m)
    wrapped = Wrap(model)

    out = wrapped(x, func="forward")          # dispatch like the PyTorch Wrap
    out = jax.block_until_ready(out)

    # Pure-f32 reference (not adjusted to the kernel's internal bf16 dot).
    ref = x.reshape(B, C, H * W).mean(axis=-1) @ model.weight + model.bias
    assert out.shape == (B, NUM_CLASSES)
    assert jnp.allclose(out, ref, atol=2e-3, rtol=2e-2), (
        float(jnp.max(jnp.abs(out - ref))))

    print("KERNEL_OK")
</pallas_src>

<mosaic_0001>
module attributes {stable_mosaic.version = 11 : i64} {
  func.func @kernel(%arg0: i32, %arg1: i32, %arg2: memref<2x4x256xf32, #tpu.memory_space<vmem>>, %arg3: memref<4x128xbf16, #tpu.memory_space<vmem>>, %arg4: memref<1x128xf32, #tpu.memory_space<vmem>>, %arg5: memref<2x128xf32, #tpu.memory_space<vmem>>, %arg6: memref<2x4xf32, #tpu.memory_space<vmem>>) attributes {dimension_semantics = [#tpu.dimension_semantics<parallel>, #tpu.dimension_semantics<arbitrary>], iteration_bounds = array<i64: 1, 1>, scalar_prefetch = 0 : i64, scratch_operands = 1 : i64, tpu.core_type = #tpu.core_type<tc>, window_params = [{transform_indices = @transform_0, window_bounds = array<i64: 2, 4, 256>}, {pipeline_mode = #tpu.pipeline_mode<synchronous>, transform_indices = @transform_1, window_bounds = array<i64: 4, 128>}, {pipeline_mode = #tpu.pipeline_mode<synchronous>, transform_indices = @transform_2, window_bounds = array<i64: 1, 128>}, {transform_indices = @transform_3, window_bounds = array<i64: 2, 128>}]} {
    %c0_i32 = arith.constant 0 : i32
    %0 = arith.cmpi eq, %arg1, %c0_i32 : i32
    %1 = arith.extui %0 : i1 to i32
    %c0_i32_0 = arith.constant 0 : i32
    %2 = arith.cmpi ne, %1, %c0_i32_0 : i32
    scf.if %2 {
      %cst_9 = arith.constant 0.000000e+00 : f32
      %11 = vector.broadcast %cst_9 : f32 to vector<2x4xf32>
      %c0_10 = arith.constant 0 : index
      %c0_11 = arith.constant 0 : index
      %12 = vector.load %arg6[%c0_10, %c0_11] : memref<2x4xf32, #tpu.memory_space<vmem>>, vector<2x4xf32>
      tpu.vector_store %arg6[%c0_10, %c0_11], %11 {strides = array<i32>} : memref<2x4xf32, #tpu.memory_space<vmem>>, vector<2x4xf32>,
    } else {
    }
    %c0 = arith.constant 0 : index
    %c0_1 = arith.constant 0 : index
    %3 = vector.load %arg6[%c0, %c0_1] : memref<2x4xf32, #tpu.memory_space<vmem>>, vector<2x4xf32>
    %c0_2 = arith.constant 0 : index
    %c0_3 = arith.constant 0 : index
    %c0_4 = arith.constant 0 : index
    %4 = vector.load %arg2[%c0_2, %c0_3, %c0_4] : memref<2x4x256xf32, #tpu.memory_space<vmem>>, vector<2x4x256xf32>
    %cst = arith.constant dense<0.000000e+00> : vector<2x4xf32>
    %5 = vector.multi_reduction <add>, %4, %cst [2] : vector<2x4x256xf32> to vector<2x4xf32>
    %6 = arith.addf %3, %5 : vector<2x4xf32>
    %c0_5 = arith.constant 0 : index
    %c0_6 = arith.constant 0 : index
    %7 = vector.load %arg6[%c0_5, %c0_6] : memref<2x4xf32, #tpu.memory_space<vmem>>, vector<2x4xf32>
    tpu.vector_store %arg6[%c0_5, %c0_6], %6 {strides = array<i32>} : memref<2x4xf32, #tpu.memory_space<vmem>>, vector<2x4xf32>,
    %c0_i32_7 = arith.constant 0 : i32
    %8 = arith.cmpi eq, %arg1, %c0_i32_7 : i32
    %9 = arith.extui %8 : i1 to i32
    %c0_i32_8 = arith.constant 0 : i32
    %10 = arith.cmpi ne, %9, %c0_i32_8 : i32
    scf.if %10 {
      %c0_9 = arith.constant 0 : index
      %c0_10 = arith.constant 0 : index
      %11 = vector.load %arg6[%c0_9, %c0_10] : memref<2x4xf32, #tpu.memory_space<vmem>>, vector<2x4xf32>
      %12 = arith.truncf %11 : vector<2x4xf32> to vector<2x4xbf16>
      %c0_11 = arith.constant 0 : index
      %c0_12 = arith.constant 0 : index
      %13 = vector.load %arg3[%c0_11, %c0_12] : memref<4x128xbf16, #tpu.memory_space<vmem>>, vector<4x128xbf16>
      %cst_13 = arith.constant dense<0.000000e+00> : vector<2x128xf32>
      %14 = tpu.matmul %12, %13, %cst_13 {dimension_numbers = #tpu.dot_dimension_numbers<[1], [0], [0], [1], [0, 0, 1, 1], [], []>} : vector<2x4xbf16>, vector<4x128xbf16>, vector<2x128xf32> -> vector<2x128xf32>
      %c0_14 = arith.constant 0 : index
      %c0_15 = arith.constant 0 : index
      %15 = vector.load %arg4[%c0_14, %c0_15] : memref<1x128xf32, #tpu.memory_space<vmem>>, vector<1x128xf32>
      %16 = vector.broadcast %15 : vector<1x128xf32> to vector<2x128xf32>
      %17 = arith.addf %14, %16 : vector<2x128xf32>
      %c0_16 = arith.constant 0 : index
      %c0_17 = arith.constant 0 : index
      %18 = vector.load %arg5[%c0_16, %c0_17] : memref<2x128xf32, #tpu.memory_space<vmem>>, vector<2x128xf32>
      tpu.vector_store %arg5[%c0_16, %c0_17], %17 {strides = array<i32>} : memref<2x128xf32, #tpu.memory_space<vmem>>, vector<2x128xf32>,
    } else {
    }
    return
  }
  func.func @transform_0(%arg0: i32, %arg1: i32) -> (i32, i32, i32) {
    %c0_i32 = arith.constant 0 : i32
    %c0_i32_0 = arith.constant 0 : i32
    return %arg0, %c0_i32, %arg1 : i32, i32, i32
  }
  func.func @transform_1(%arg0: i32, %arg1: i32) -> (i32, i32) {
    %c0_i32 = arith.constant 0 : i32
    %c0_i32_0 = arith.constant 0 : i32
    %c0_i32_1 = arith.constant 0 : i32
    return %c0_i32, %c0_i32_0 : i32, i32
  }
  func.func @transform_2(%arg0: i32, %arg1: i32) -> (i32, i32) {
    %c0_i32 = arith.constant 0 : i32
    %c0_i32_0 = arith.constant 0 : i32
    %c0_i32_1 = arith.constant 0 : i32
    return %c0_i32, %c0_i32_0 : i32, i32
  }
  func.func @transform_3(%arg0: i32, %arg1: i32) -> (i32, i32) {
    %c0_i32 = arith.constant 0 : i32
    %c0_i32_0 = arith.constant 0 : i32
    return %arg0, %c0_i32 : i32, i32
  }
}

</mosaic_0001>

<bundles_post_ra>
// kernel: pool_linear.1
= control target key start
LH: loop header
LB: loop body
LE: loop exit
PB: predicated region body
PF: predicated region fallthrough
CT: control target
= control target key end

     0   :  { %vm31_vm0 = vcmask 1043456   ;;  %s224_s0 = inlined_call_operand.vmem [shape: f32[2,4,256], index: 0, kind: input, shape index: {}]   ;;  %s225_s1 = inlined_call_operand.vmem [shape: bf16[4,128], index: 1, kind: input, shape index: {}]   ;;  %s226_s2 = inlined_call_operand.vmem [shape: f32[1,128], index: 2, kind: input, shape index: {}]   ;;  %s227_s3 = inlined_call_operand.hbm [shape: f32[2,128], index: 3, kind: output, shape index: {}]  }
   0x1   :  { %v23_v0 = vld [vmem:[%s224_s0] sm:$0xff]  ;;  %v24_v1 = vld [vmem:[%s224_s0 + $0x8] sm:$0xff] }
   0x2   :  { %8 = vsyncpa [#allocation4], 0  ;;  %v27_v2 = vcombine.high %v23_v0, %v23_v0  ;;  %v32_v3 = vsel %vm31_vm0, %v23_v0, 0.0  ;;  %v28_v4 = vcombine.high %v24_v1, %v24_v1  ;;  %v37_v6 = vsel %vm31_vm0, %v24_v1, 0.0  ;;  %v65_v11 = vld [vmem:[%s225_s1] sm:$0x3] }
   0x3   :  { %vm20_vm1 = vcmask 25600   ;;  %v175_v10 = vmov 0.0   ;;  %vm77_vm2 = vcmask 1041408   ;;  %vm176_vm3 = vmmov 0   ;;  %v136_v26 = vld [vmem:[%s226_s2] ss:$0 sm:$0xff] }
   0x4   :  { %v33_v5 = vsel %vm31_vm0, %v27_v2, 0.0  ;;  %v38_v7 = vsel %vm31_vm0, %v28_v4, 0.0  ;;  %21 = vst.msk [vmem:[#allocation2] sm:$0x3] %vm20_vm1, %v175_v10  ;;  %140 = vmatprep.subr.bf16.mxu0 %v175_v10  ;;  %v79_v12 = vsel %vm77_vm2, %v65_v11, 0  ;;  %142 = vmatprep.mubr.msk.bf16.mxu0 %vm176_vm3, %v175_v10  ;;  %v44_v13 = vlaneseq  ;;  %s177_s18 = smov [#allocation3]  }
   0x5   :  { %v34_v8 = vadd.f32 %v33_v5, %v32_v3  ;;  %v39_v9 = vadd.f32 %v38_v7, %v37_v6  ;;  %141 = vmatpush3.bf16.msra.mxu0 %v79_v12  ;;  %vm54_vm4 = vcmask 1041409   ;;  %vm73_vm5 = vcmask 31744   ;;  %s128_s19 = sshll.u32 %s177_s18, 4  ;;  %s129_s19 = int_to_ptr.vmem [resolvable:$true] %s128_s19 }
   0x6   :  { %v45_v14 = vand.u32 127, %v44_v13  ;;  %v47_v15 = vshrl.u32 %v44_v13, 7  ;;  %s151_s20 = scalar_lea.vmem %s129_s19, 32  ;;  %p156_p1 = scmp.lt.s32.totalorder %s129_s19, %s129_s19 }
   0x7   :  { %35 = vadd.xlane.f32.xlu0 %v34_v8  ;;  %p152_p0 = scmp.ne.s32.totalorder %s129_s19, %s151_s20  ;;  %p157_p2 = scmp.lt.s32.totalorder %s151_s20, %s151_s20 }
   0x8   :  { %v48_v17 = vsub.s32 %v45_v14, %v47_v15 }
   0x9   :  { %p158_p3 = por %p157_p2, %p156_p1 }
   0xb   :  { %40 = vadd.xlane.f32.xlu0 %v39_v9  ;;  %v22_v21 = vld [vmem:[#allocation2] sm:$0x3]  ;;  %p159_p4 = pnand %p158_p3, %p152_p0 }
  0x94   :  { %v36_v16 = vpop.xlane.xlu0 %35 }
  0x95   :  { %v49_v19 = vrot.slane %v36_v16, %v48_v17 }
  0x98   :  { %v41_v18 = vpop.xlane.xlu0 %40 }
  0x99   :  { %v53_v20 = vrot.slane %v41_v18, %v48_v17 }
  0x9b   :  { %v55_v22 = vsel %vm54_vm4, %v53_v20, %v49_v19 }
  0x9c   :  { %v57_v23 = vadd.f32 %v55_v22, %v22_v21 }
  0x9e   :  { %59 = vst.msk [vmem:[#allocation2] sm:$0x3] %vm20_vm1, %v57_v23 }
  0xa5   :  { %v63_v24 = vld [vmem:[#allocation2] sm:$0x3] }
  0xa6   :  { %v64_v25 = vpack.c.bf16 %v63_v24, %v63_v24 }
  0xa8   :  { %143 = vmatmul.mubr.msk.bf16.vlgmr.msra.gmra.mrb[0].mxu0 %vm73_vm5, %v64_v25 }
 0x17b   :  { %v115_v27 = vpop.f32.mrb[0].mxu0 }
 0x17c   :  { %v116_v28 = vadd.f32 %v136_v26, %v115_v27  ;;  %v144_v29 = vpop.f32.mrb[1].mxu0 }
 0x17d   :  { %v118_v30 = vpop.f32.mrb[2].mxu0 }
 0x17e   :  { %121 = vst [vmem:[#allocation3] sm:$0x3] %v116_v28  ;;  %v145_v31 = vpop.f32.mrb[3].mxu0 }
 0x17f   :  { %162 = shalt.err (!%p159_p4)
}
 0x180   :  { %s163_s2 = scalar_lea.hbm %s227_s3, 32 }
 0x181   :  { %p164_p5 = scmp.ne.s32.totalorder %s227_s3, %s163_s2  ;;  %p167_p6 = scmp.lt.u32.totalorder %s163_s2, %s227_s3 }
 0x183   :  { %p169_p7 = pnand %p167_p6, %p164_p5 }
 0x185   :  { %172 = shalt.err (!%p169_p7)
}
 0x186   :  { %131 = dma.vmem_to_hbm [thread:$0]  %s129_s19, 32, %s227_s3, [#allocation4]  }
 0x187   :  { %173 = dma.done.wait [#allocation4], 32  }
 0x188   :  { %174 = vsyncadd [#allocation4], 4294967264 }
 0x189   :  { %135 = vsyncpa [#allocation4], 1 }

</bundles_post_ra>
